<compile_context>
chip_gen: v7x
topology: tpu7x:2x2x1
jax: 0.10.0
libtpu: 0.0.40
codegen_flags: <defaults>
</compile_context>

<pallas_src>
import functools
import math

import jax
import jax.numpy as jnp
from jax import lax
from jax.experimental import pallas as pl
from jax.experimental.pallas import tpu as pltpu

_EPS = 1e-5             # nn.LayerNorm default eps
_LANE_TARGET = 512      # target lane width (multiple of 128) per grid step
_INV_SQRT2 = 1.0 / math.sqrt(2.0)


# --------------------------- in-kernel helpers ---------------------------

def _gelu_exact(x):
    # PyTorch nn.GELU() default = exact (erf-based) GELU; erf runs on the EUP.
    return 0.5 * x * (1.0 + lax.erf(x * _INV_SQRT2))


def _ln_per_sample(x, gamma, beta, pc):
    """LayerNorm over each sample's (T, C) slab, in packed (T, B_blk*C) layout.

    pc is (L, L) with 1/C inside each sample's CxC diagonal block, so x @ pc
    broadcasts each sample's per-row channel mean back onto that sample's lanes.
    """
    mu = jnp.mean(jnp.dot(x, pc, preferred_element_type=jnp.float32),
                  axis=0, keepdims=True)                   # (1, L) per-sample mean
    xc = x - mu
    var = jnp.mean(jnp.dot(xc * xc, pc, preferred_element_type=jnp.float32),
                   axis=0, keepdims=True)                  # (1, L) per-sample var
    return xc * lax.rsqrt(var + _EPS) * gamma + beta


def _mixer2d_triu(x, p, pc):
    """One Mixer2dTriU block on a packed (T, L = B_blk*C) slab."""
    ln1_g, ln1_b, ln2_g, ln2_b, tri_w, tri_b, cw1_bd, cb1, cw2_bd, cb2 = p
    x1 = _ln_per_sample(x, ln1_g, ln1_b, pc)
    # TriU time mixer: causal (lower-triangular) linear mix along time.
    y = jnp.dot(tri_w, x1, preferred_element_type=jnp.float32) + tri_b
    x2 = _ln_per_sample(y + x, ln2_g, ln2_b, pc)           # residual with ORIGINAL x
    # Channel mixer (Linear C->C, GELU, Linear C->C) as block-diagonal GEMMs.
    h = _gelu_exact(jnp.dot(x2, cw1_bd, preferred_element_type=jnp.float32) + cb1)
    y2 = jnp.dot(h, cw2_bd, preferred_element_type=jnp.float32) + cb2
    return x2 + y2


def _mult_mixer_kernel(x_ref, xh_ref, pc_ref,
                       f_ln1g, f_ln1b, f_ln2g, f_ln2b, f_tw, f_tb,
                       f_cw1, f_cb1, f_cw2, f_cb2,
                       h_ln1g, h_ln1b, h_ln2g, h_ln2b, h_tw, h_tb,
                       h_cw1, h_cb1, h_cw2, h_cb2,
                       o_ref, *, t_full, t_half):
    x = x_ref[...]
    xh = xh_ref[...]
    pc = pc_ref[...]
    full_p = tuple(r[...] for r in (f_ln1g, f_ln1b, f_ln2g, f_ln2b, f_tw, f_tb,
                                    f_cw1, f_cb1, f_cw2, f_cb2))
    half_p = tuple(r[...] for r in (h_ln1g, h_ln1b, h_ln2g, h_ln2b, h_tw, h_tb,
                                    h_cw1, h_cb1, h_cw2, h_cb2))

    # Fused torch.cat([inputs, mix(inputs), mix_half(x1)], dim=1) along rows.
    o_ref[0:t_full, :] = x
    o_ref[t_full:2 * t_full, :] = _mixer2d_triu(x, full_p, pc)
    o_ref[2 * t_full:2 * t_full + t_half, :] = _mixer2d_triu(xh, half_p, pc)


# ------------------------------ wrapper ----------------------------------

def _plan_blocks(batch, channels):
    """Samples per grid step: block lane width is either the full batch*channels
    (single block) or a multiple of 128 (lane-dense batch tiling)."""
    total = batch * channels
    if total <= max(_LANE_TARGET, 128):
        return batch, 1
    unit = (channels * 128) // math.gcd(channels, 128)      # lcm(C, 128)
    lane_width = max(unit, (_LANE_TARGET // unit) * unit)
    b_blk = lane_width // channels
    n_blk = -(-batch // b_blk)
    return b_blk, n_blk


def _block_diag(w, n):
    """Block-diagonal replication of a (Cin, Cout) matrix, n times."""
    return jnp.kron(jnp.eye(n, dtype=w.dtype), w)


def _pack_mixer_params(p, t, c, b_blk):
    tile = lambda a: jnp.tile(a, (1, b_blk))
    return (
        tile(p["ln1_g"]), tile(p["ln1_b"]), tile(p["ln2_g"]), tile(p["ln2_b"]),
        p["tri_w"], p["tri_b"].reshape(t, 1),
        _block_diag(p["cw1_t"], b_blk), tile(p["cb1"].reshape(1, c)),
        _block_diag(p["cw2_t"], b_blk), tile(p["cb2"].reshape(1, c)),
    )


@jax.jit
def mult_time_2d_mixer(inputs, x1, params):
    """MultTime2dMixer forward: cat([inputs, mix(inputs), mix_half(x1)], dim=1).

    inputs: (B, T, C) f32, x1: (B, T//2, C) f32  ->  (B, 2T + T//2, C) f32.
    """
    B, T, C = inputs.shape
    Bh, Th, Ch = x1.shape
    assert Bh == B and Ch == C
    t_total = 2 * T + Th

    b_blk, n_blk = _plan_blocks(B, C)
    b_pad = b_blk * n_blk
    l_blk = b_blk * C

    if b_pad != B:
        pad = ((0, b_pad - B), (0, 0), (0, 0))
        inputs_p = jnp.pad(inputs, pad)
        x1_p = jnp.pad(x1, pad)
    else:
        inputs_p, x1_p = inputs, x1

    # (B, T, C) -> (T, B*C): time-major, batch packed along the lane axis.
    x2d = jnp.transpose(inputs_p, (1, 0, 2)).reshape(T, b_pad * C)
    xh2d = jnp.transpose(x1_p, (1, 0, 2)).reshape(Th, b_pad * C)

    # Per-sample channel-averaging matrix (block matrix of 1/C).
    pc = _block_diag(jnp.full((C, C), 1.0 / C, jnp.float32), b_blk)

    args = ((x2d, xh2d, pc)
            + _pack_mixer_params(params["full"], T, C, b_blk)
            + _pack_mixer_params(params["half"], Th, C, b_blk))

    # Activations tile along the lane (batch-block) axis; all weights are
    # grid-invariant full-array blocks (constant index_map).
    in_specs = [
        pl.BlockSpec((T, l_blk), lambda i: (0, i)),
        pl.BlockSpec((Th, l_blk), lambda i: (0, i)),
    ] + [pl.BlockSpec(a.shape, lambda i: (0, 0)) for a in args[2:]]
    out_spec = pl.BlockSpec((t_total, l_blk), lambda i: (0, i))

    out2d = pl.pallas_call(
        functools.partial(_mult_mixer_kernel, t_full=T, t_half=Th),
        out_shape=jax.ShapeDtypeStruct((t_total, b_pad * C), jnp.float32),
        grid_spec=pltpu.PrefetchScalarGridSpec(
            num_scalar_prefetch=0,
            grid=(n_blk,),
            in_specs=in_specs,
            out_specs=out_spec,
        ),
        compiler_params=pltpu.CompilerParams(
            dimension_semantics=("parallel",),
            vmem_limit_bytes=32 * 1024 * 1024,
        ),
    )(*args)

    out = out2d.reshape(t_total, b_pad, C).transpose(1, 0, 2)
    return out[:B]


# ------------------------ params & pure-JAX reference --------------------

def _init_mixer_params(key, t, c):
    ks = jax.random.split(key, 6)
    # TriU row i is nn.Linear(i+1, 1): lower-triangular (t, t) weight + (t,) bias,
    # each row ~ U(-1/sqrt(i+1), 1/sqrt(i+1)) (PyTorch default init).
    row_bound = 1.0 / jnp.sqrt(jnp.arange(1, t + 1, dtype=jnp.float32))
    tri_w = jnp.tril(
        jax.random.uniform(ks[0], (t, t), jnp.float32, -1.0, 1.0) * row_bound[:, None])
    tri_b = jax.random.uniform(ks[1], (t,), jnp.float32, -1.0, 1.0) * row_bound
    cb = 1.0 / math.sqrt(c)
    # Channel-mixer weights stored pre-transposed (in, out): forward uses x @ W.
    cw1_t = jax.random.uniform(ks[2], (c, c), jnp.float32, -cb, cb)
    cb1 = jax.random.uniform(ks[3], (c,), jnp.float32, -cb, cb)
    cw2_t = jax.random.uniform(ks[4], (c, c), jnp.float32, -cb, cb)
    cb2 = jax.random.uniform(ks[5], (c,), jnp.float32, -cb, cb)
    return {
        "ln1_g": jnp.ones((t, c), jnp.float32), "ln1_b": jnp.zeros((t, c), jnp.float32),
        "ln2_g": jnp.ones((t, c), jnp.float32), "ln2_b": jnp.zeros((t, c), jnp.float32),
        "tri_w": tri_w, "tri_b": tri_b,
        "cw1_t": cw1_t, "cb1": cb1, "cw2_t": cw2_t, "cb2": cb2,
    }


def init_params(key, time_step, channel):
    kf, kh = jax.random.split(key)
    return {"full": _init_mixer_params(kf, time_step, channel),
            "half": _init_mixer_params(kh, time_step // 2, channel)}


def _mixer2d_triu_ref(x, p):
    def ln(v, g, b):
        mu = jnp.mean(v, axis=(-2, -1), keepdims=True)
        var = jnp.mean((v - mu) ** 2, axis=(-2, -1), keepdims=True)
        return (v - mu) * lax.rsqrt(var + _EPS) * g + b

    hi = lax.Precision.HIGHEST
    x1 = ln(x, p["ln1_g"], p["ln1_b"])
    # TriU: out[b, t, c] = sum_{s <= t} tri_w[t, s] * x1[b, s, c] + tri_b[t]
    y = jnp.einsum("bsc,ts->btc", x1, p["tri_w"], precision=hi) \
        + p["tri_b"][None, :, None]
    x2 = ln(y + x, p["ln2_g"], p["ln2_b"])
    h = _gelu_exact(jnp.matmul(x2, p["cw1_t"], precision=hi) + p["cb1"])
    y2 = jnp.matmul(h, p["cw2_t"], precision=hi) + p["cb2"]
    return x2 + y2


def mult_time_2d_mixer_ref(inputs, x1, params):
    return jnp.concatenate(
        [inputs,
         _mixer2d_triu_ref(inputs, params["full"]),
         _mixer2d_triu_ref(x1, params["half"])], axis=1)


# ------------------------------- test ------------------------------------

if __name__ == "__main__":
    B, T, C = 2, 16, 8            # batch, time_step, channel; x1 uses T//2 steps
    key = jax.random.PRNGKey(0)
    kx, kx1, kp = jax.random.split(key, 3)
    inputs = jax.random.normal(kx, (B, T, C), jnp.float32)
    x1 = jax.random.normal(kx1, (B, T // 2, C), jnp.float32)
    params = init_params(kp, T, C)

    out = mult_time_2d_mixer(inputs, x1, params)
    out = jax.block_until_ready(out)

    ref = mult_time_2d_mixer_ref(inputs, x1, params)
    assert out.shape == (B, 2 * T + T // 2, C), out.shape
    err = float(jnp.max(jnp.abs(out - ref)))
    assert jnp.allclose(out, ref, atol=1e-3, rtol=1e-3), err

    print("KERNEL_OK")
</pallas_src>

<mosaic_0001>
module attributes {stable_mosaic.version = 11 : i64} {
  func.func @_mult_mixer_kernel(%arg0: i32, %arg1: memref<16x16xf32, #tpu.memory_space<vmem>>, %arg2: memref<8x16xf32, #tpu.memory_space<vmem>>, %arg3: memref<16x16xf32, #tpu.memory_space<vmem>>, %arg4: memref<16x16xf32, #tpu.memory_space<vmem>>, %arg5: memref<16x16xf32, #tpu.memory_space<vmem>>, %arg6: memref<16x16xf32, #tpu.memory_space<vmem>>, %arg7: memref<16x16xf32, #tpu.memory_space<vmem>>, %arg8: memref<16x16xf32, #tpu.memory_space<vmem>>, %arg9: memref<16x1xf32, #tpu.memory_space<vmem>>, %arg10: memref<16x16xf32, #tpu.memory_space<vmem>>, %arg11: memref<1x16xf32, #tpu.memory_space<vmem>>, %arg12: memref<16x16xf32, #tpu.memory_space<vmem>>, %arg13: memref<1x16xf32, #tpu.memory_space<vmem>>, %arg14: memref<8x16xf32, #tpu.memory_space<vmem>>, %arg15: memref<8x16xf32, #tpu.memory_space<vmem>>, %arg16: memref<8x16xf32, #tpu.memory_space<vmem>>, %arg17: memref<8x16xf32, #tpu.memory_space<vmem>>, %arg18: memref<8x8xf32, #tpu.memory_space<vmem>>, %arg19: memref<8x1xf32, #tpu.memory_space<vmem>>, %arg20: memref<16x16xf32, #tpu.memory_space<vmem>>, %arg21: memref<1x16xf32, #tpu.memory_space<vmem>>, %arg22: memref<16x16xf32, #tpu.memory_space<vmem>>, %arg23: memref<1x16xf32, #tpu.memory_space<vmem>>, %arg24: memref<40x16xf32, #tpu.memory_space<vmem>>) attributes {dimension_semantics = [#tpu.dimension_semantics<parallel>], iteration_bounds = array<i64: 1>, scalar_prefetch = 0 : i64, scratch_operands = 0 : i64, tpu.core_type = #tpu.core_type<tc>, window_params = [{transform_indices = @transform_0, window_bounds = array<i64: 16, 16>}, {transform_indices = @transform_1, window_bounds = array<i64: 8, 16>}, {pipeline_mode = #tpu.pipeline_mode<synchronous>, transform_indices = @transform_2, window_bounds = array<i64: 16, 16>}, {pipeline_mode = #tpu.pipeline_mode<synchronous>, transform_indices = @transform_3, window_bounds = array<i64: 16, 16>}, {pipeline_mode = #tpu.pipeline_mode<synchronous>, transform_indices = @transform_4, window_bounds = array<i64: 16, 16>}, {pipeline_mode = #tpu.pipeline_mode<synchronous>, transform_indices = @transform_5, window_bounds = array<i64: 16, 16>}, {pipeline_mode = #tpu.pipeline_mode<synchronous>, transform_indices = @transform_6, window_bounds = array<i64: 16, 16>}, {pipeline_mode = #tpu.pipeline_mode<synchronous>, transform_indices = @transform_7, window_bounds = array<i64: 16, 16>}, {pipeline_mode = #tpu.pipeline_mode<synchronous>, transform_indices = @transform_8, window_bounds = array<i64: 16, 1>}, {pipeline_mode = #tpu.pipeline_mode<synchronous>, transform_indices = @transform_9, window_bounds = array<i64: 16, 16>}, {pipeline_mode = #tpu.pipeline_mode<synchronous>, transform_indices = @transform_10, window_bounds = array<i64: 1, 16>}, {pipeline_mode = #tpu.pipeline_mode<synchronous>, transform_indices = @transform_11, window_bounds = array<i64: 16, 16>}, {pipeline_mode = #tpu.pipeline_mode<synchronous>, transform_indices = @transform_12, window_bounds = array<i64: 1, 16>}, {pipeline_mode = #tpu.pipeline_mode<synchronous>, transform_indices = @transform_13, window_bounds = array<i64: 8, 16>}, {pipeline_mode = #tpu.pipeline_mode<synchronous>, transform_indices = @transform_14, window_bounds = array<i64: 8, 16>}, {pipeline_mode = #tpu.pipeline_mode<synchronous>, transform_indices = @transform_15, window_bounds = array<i64: 8, 16>}, {pipeline_mode = #tpu.pipeline_mode<synchronous>, transform_indices = @transform_16, window_bounds = array<i64: 8, 16>}, {pipeline_mode = #tpu.pipeline_mode<synchronous>, transform_indices = @transform_17, window_bounds = array<i64: 8, 8>}, {pipeline_mode = #tpu.pipeline_mode<synchronous>, transform_indices = @transform_18, window_bounds = array<i64: 8, 1>}, {pipeline_mode = #tpu.pipeline_mode<synchronous>, transform_indices = @transform_19, window_bounds = array<i64: 16, 16>}, {pipeline_mode = #tpu.pipeline_mode<synchronous>, transform_indices = @transform_20, window_bounds = array<i64: 1, 16>}, {pipeline_mode = #tpu.pipeline_mode<synchronous>, transform_indices = @transform_21, window_bounds = array<i64: 16, 16>}, {pipeline_mode = #tpu.pipeline_mode<synchronous>, transform_indices = @transform_22, window_bounds = array<i64: 1, 16>}, {transform_indices = @transform_23, window_bounds = array<i64: 40, 16>}]} {
    %c0 = arith.constant 0 : index
    %c0_0 = arith.constant 0 : index
    %0 = vector.load %arg1[%c0, %c0_0] : memref<16x16xf32, #tpu.memory_space<vmem>>, vector<16x16xf32>
    %c0_1 = arith.constant 0 : index
    %c0_2 = arith.constant 0 : index
    %1 = vector.load %arg2[%c0_1, %c0_2] : memref<8x16xf32, #tpu.memory_space<vmem>>, vector<8x16xf32>
    %c0_3 = arith.constant 0 : index
    %c0_4 = arith.constant 0 : index
    %2 = vector.load %arg3[%c0_3, %c0_4] : memref<16x16xf32, #tpu.memory_space<vmem>>, vector<16x16xf32>
    %c0_5 = arith.constant 0 : index
    %c0_6 = arith.constant 0 : index
    %3 = vector.load %arg4[%c0_5, %c0_6] : memref<16x16xf32, #tpu.memory_space<vmem>>, vector<16x16xf32>
    %c0_7 = arith.constant 0 : index
    %c0_8 = arith.constant 0 : index
    %4 = vector.load %arg5[%c0_7, %c0_8] : memref<16x16xf32, #tpu.memory_space<vmem>>, vector<16x16xf32>
    %c0_9 = arith.constant 0 : index
    %c0_10 = arith.constant 0 : index
    %5 = vector.load %arg6[%c0_9, %c0_10] : memref<16x16xf32, #tpu.memory_space<vmem>>, vector<16x16xf32>
    %c0_11 = arith.constant 0 : index
    %c0_12 = arith.constant 0 : index
    %6 = vector.load %arg7[%c0_11, %c0_12] : memref<16x16xf32, #tpu.memory_space<vmem>>, vector<16x16xf32>
    %c0_13 = arith.constant 0 : index
    %c0_14 = arith.constant 0 : index
    %7 = vector.load %arg8[%c0_13, %c0_14] : memref<16x16xf32, #tpu.memory_space<vmem>>, vector<16x16xf32>
    %c0_15 = arith.constant 0 : index
    %c0_16 = arith.constant 0 : index
    %8 = vector.load %arg9[%c0_15, %c0_16] : memref<16x1xf32, #tpu.memory_space<vmem>>, vector<16x1xf32>
    %c0_17 = arith.constant 0 : index
    %c0_18 = arith.constant 0 : index
    %9 = vector.load %arg10[%c0_17, %c0_18] : memref<16x16xf32, #tpu.memory_space<vmem>>, vector<16x16xf32>
    %c0_19 = arith.constant 0 : index
    %c0_20 = arith.constant 0 : index
    %10 = vector.load %arg11[%c0_19, %c0_20] : memref<1x16xf32, #tpu.memory_space<vmem>>, vector<1x16xf32>
    %c0_21 = arith.constant 0 : index
    %c0_22 = arith.constant 0 : index
    %11 = vector.load %arg12[%c0_21, %c0_22] : memref<16x16xf32, #tpu.memory_space<vmem>>, vector<16x16xf32>
    %c0_23 = arith.constant 0 : index
    %c0_24 = arith.constant 0 : index
    %12 = vector.load %arg13[%c0_23, %c0_24] : memref<1x16xf32, #tpu.memory_space<vmem>>, vector<1x16xf32>
    %c0_25 = arith.constant 0 : index
    %c0_26 = arith.constant 0 : index
    %13 = vector.load %arg14[%c0_25, %c0_26] : memref<8x16xf32, #tpu.memory_space<vmem>>, vector<8x16xf32>
    %c0_27 = arith.constant 0 : index
    %c0_28 = arith.constant 0 : index
    %14 = vector.load %arg15[%c0_27, %c0_28] : memref<8x16xf32, #tpu.memory_space<vmem>>, vector<8x16xf32>
    %c0_29 = arith.constant 0 : index
    %c0_30 = arith.constant 0 : index
    %15 = vector.load %arg16[%c0_29, %c0_30] : memref<8x16xf32, #tpu.memory_space<vmem>>, vector<8x16xf32>
    %c0_31 = arith.constant 0 : index
    %c0_32 = arith.constant 0 : index
    %16 = vector.load %arg17[%c0_31, %c0_32] : memref<8x16xf32, #tpu.memory_space<vmem>>, vector<8x16xf32>
    %c0_33 = arith.constant 0 : index
    %c0_34 = arith.constant 0 : index
    %17 = vector.load %arg18[%c0_33, %c0_34] : memref<8x8xf32, #tpu.memory_space<vmem>>, vector<8x8xf32>
    %c0_35 = arith.constant 0 : index
    %c0_36 = arith.constant 0 : index
    %18 = vector.load %arg19[%c0_35, %c0_36] : memref<8x1xf32, #tpu.memory_space<vmem>>, vector<8x1xf32>
    %c0_37 = arith.constant 0 : index
    %c0_38 = arith.constant 0 : index
    %19 = vector.load %arg20[%c0_37, %c0_38] : memref<16x16xf32, #tpu.memory_space<vmem>>, vector<16x16xf32>
    %c0_39 = arith.constant 0 : index
    %c0_40 = arith.constant 0 : index
    %20 = vector.load %arg21[%c0_39, %c0_40] : memref<1x16xf32, #tpu.memory_space<vmem>>, vector<1x16xf32>
    %c0_41 = arith.constant 0 : index
    %c0_42 = arith.constant 0 : index
    %21 = vector.load %arg22[%c0_41, %c0_42] : memref<16x16xf32, #tpu.memory_space<vmem>>, vector<16x16xf32>
    %c0_43 = arith.constant 0 : index
    %c0_44 = arith.constant 0 : index
    %22 = vector.load %arg23[%c0_43, %c0_44] : memref<1x16xf32, #tpu.memory_space<vmem>>, vector<1x16xf32>
    %c0_45 = arith.constant 0 : index
    %c0_46 = arith.constant 0 : index
    %23 = vector.load %arg24[%c0_45, %c0_46] : memref<40x16xf32, #tpu.memory_space<vmem>>, vector<16x16xf32>
    tpu.vector_store %arg24[%c0_45, %c0_46], %0 {strides = array<i32>} : memref<40x16xf32, #tpu.memory_space<vmem>>, vector<16x16xf32>,
    %cst = arith.constant dense<0.000000e+00> : vector<16x16xf32>
    %24 = tpu.matmul %0, %2, %cst {dimension_numbers = #tpu.dot_dimension_numbers<[1], [0], [0], [1], [0, 0, 1, 1], [], []>} : vector<16x16xf32>, vector<16x16xf32>, vector<16x16xf32> -> vector<16x16xf32>
    %cst_47 = arith.constant dense<0.000000e+00> : vector<16xf32>
    %25 = vector.multi_reduction <add>, %24, %cst_47 [0] : vector<16x16xf32> to vector<16xf32>
    %26 = vector.shape_cast %25 : vector<16xf32> to vector<1x16xf32>
    %cst_48 = arith.constant 1.600000e+01 : f32
    %27 = vector.broadcast %cst_48 : f32 to vector<1x16xf32>
    %28 = arith.divf %26, %27 : vector<1x16xf32>
    %29 = vector.broadcast %28 : vector<1x16xf32> to vector<16x16xf32>
    %30 = arith.subf %0, %29 : vector<16x16xf32>
    %31 = arith.mulf %30, %30 : vector<16x16xf32>
    %cst_49 = arith.constant dense<0.000000e+00> : vector<16x16xf32>
    %32 = tpu.matmul %31, %2, %cst_49 {dimension_numbers = #tpu.dot_dimension_numbers<[1], [0], [0], [1], [0, 0, 1, 1], [], []>} : vector<16x16xf32>, vector<16x16xf32>, vector<16x16xf32> -> vector<16x16xf32>
    %cst_50 = arith.constant dense<0.000000e+00> : vector<16xf32>
    %33 = vector.multi_reduction <add>, %32, %cst_50 [0] : vector<16x16xf32> to vector<16xf32>
    %34 = vector.shape_cast %33 : vector<16xf32> to vector<1x16xf32>
    %cst_51 = arith.constant 1.600000e+01 : f32
    %35 = vector.broadcast %cst_51 : f32 to vector<1x16xf32>
    %36 = arith.divf %34, %35 : vector<1x16xf32>
    %cst_52 = arith.constant 9.99999974E-6 : f32
    %37 = vector.broadcast %cst_52 : f32 to vector<1x16xf32>
    %38 = arith.addf %36, %37 : vector<1x16xf32>
    %39 = math.rsqrt %38 : vector<1x16xf32>
    %40 = vector.broadcast %39 : vector<1x16xf32> to vector<16x16xf32>
    %41 = arith.mulf %30, %40 : vector<16x16xf32>
    %42 = arith.mulf %41, %3 : vector<16x16xf32>
    %43 = arith.addf %42, %4 : vector<16x16xf32>
    %cst_53 = arith.constant dense<0.000000e+00> : vector<16x16xf32>
    %44 = tpu.matmul %7, %43, %cst_53 {dimension_numbers = #tpu.dot_dimension_numbers<[1], [0], [0], [1], [0, 0, 1, 1], [], []>} : vector<16x16xf32>, vector<16x16xf32>, vector<16x16xf32> -> vector<16x16xf32>
    %45 = vector.broadcast %8 : vector<16x1xf32> to vector<16x16xf32>
    %46 = arith.addf %44, %45 : vector<16x16xf32>
    %47 = arith.addf %46, %0 : vector<16x16xf32>
    %cst_54 = arith.constant dense<0.000000e+00> : vector<16x16xf32>
    %48 = tpu.matmul %47, %2, %cst_54 {dimension_numbers = #tpu.dot_dimension_numbers<[1], [0], [0], [1], [0, 0, 1, 1], [], []>} : vector<16x16xf32>, vector<16x16xf32>, vector<16x16xf32> -> vector<16x16xf32>
    %cst_55 = arith.constant dense<0.000000e+00> : vector<16xf32>
    %49 = vector.multi_reduction <add>, %48, %cst_55 [0] : vector<16x16xf32> to vector<16xf32>
    %50 = vector.shape_cast %49 : vector<16xf32> to vector<1x16xf32>
    %cst_56 = arith.constant 1.600000e+01 : f32
    %51 = vector.broadcast %cst_56 : f32 to vector<1x16xf32>
    %52 = arith.divf %50, %51 : vector<1x16xf32>
    %53 = vector.broadcast %52 : vector<1x16xf32> to vector<16x16xf32>
    %54 = arith.subf %47, %53 : vector<16x16xf32>
    %55 = arith.mulf %54, %54 : vector<16x16xf32>
    %cst_57 = arith.constant dense<0.000000e+00> : vector<16x16xf32>
    %56 = tpu.matmul %55, %2, %cst_57 {dimension_numbers = #tpu.dot_dimension_numbers<[1], [0], [0], [1], [0, 0, 1, 1], [], []>} : vector<16x16xf32>, vector<16x16xf32>, vector<16x16xf32> -> vector<16x16xf32>
    %cst_58 = arith.constant dense<0.000000e+00> : vector<16xf32>
    %57 = vector.multi_reduction <add>, %56, %cst_58 [0] : vector<16x16xf32> to vector<16xf32>
    %58 = vector.shape_cast %57 : vector<16xf32> to vector<1x16xf32>
    %cst_59 = arith.constant 1.600000e+01 : f32
    %59 = vector.broadcast %cst_59 : f32 to vector<1x16xf32>
    %60 = arith.divf %58, %59 : vector<1x16xf32>
    %cst_60 = arith.constant 9.99999974E-6 : f32
    %61 = vector.broadcast %cst_60 : f32 to vector<1x16xf32>
    %62 = arith.addf %60, %61 : vector<1x16xf32>
    %63 = math.rsqrt %62 : vector<1x16xf32>
    %64 = vector.broadcast %63 : vector<1x16xf32> to vector<16x16xf32>
    %65 = arith.mulf %54, %64 : vector<16x16xf32>
    %66 = arith.mulf %65, %5 : vector<16x16xf32>
    %67 = arith.addf %66, %6 : vector<16x16xf32>
    %cst_61 = arith.constant dense<0.000000e+00> : vector<16x16xf32>
    %68 = tpu.matmul %67, %9, %cst_61 {dimension_numbers = #tpu.dot_dimension_numbers<[1], [0], [0], [1], [0, 0, 1, 1], [], []>} : vector<16x16xf32>, vector<16x16xf32>, vector<16x16xf32> -> vector<16x16xf32>
    %69 = vector.broadcast %10 : vector<1x16xf32> to vector<16x16xf32>
    %70 = arith.addf %68, %69 : vector<16x16xf32>
    %cst_62 = arith.constant 5.000000e-01 : f32
    %71 = vector.broadcast %cst_62 : f32 to vector<16x16xf32>
    %72 = arith.mulf %71, %70 : vector<16x16xf32>
    %cst_63 = arith.constant 0.707106769 : f32
    %73 = vector.broadcast %cst_63 : f32 to vector<16x16xf32>
    %74 = arith.mulf %70, %73 : vector<16x16xf32>
    %75 = math.erf %74 : vector<16x16xf32>
    %cst_64 = arith.constant 1.000000e+00 : f32
    %76 = vector.broadcast %cst_64 : f32 to vector<16x16xf32>
    %77 = arith.addf %76, %75 : vector<16x16xf32>
    %78 = arith.mulf %72, %77 : vector<16x16xf32>
    %cst_65 = arith.constant dense<0.000000e+00> : vector<16x16xf32>
    %79 = tpu.matmul %78, %11, %cst_65 {dimension_numbers = #tpu.dot_dimension_numbers<[1], [0], [0], [1], [0, 0, 1, 1], [], []>} : vector<16x16xf32>, vector<16x16xf32>, vector<16x16xf32> -> vector<16x16xf32>
    %80 = vector.broadcast %12 : vector<1x16xf32> to vector<16x16xf32>
    %81 = arith.addf %79, %80 : vector<16x16xf32>
    %82 = arith.addf %67, %81 : vector<16x16xf32>
    %c16 = arith.constant 16 : index
    %c0_66 = arith.constant 0 : index
    %83 = vector.load %arg24[%c16, %c0_66] : memref<40x16xf32, #tpu.memory_space<vmem>>, vector<16x16xf32>
    tpu.vector_store %arg24[%c16, %c0_66], %82 {strides = array<i32>} : memref<40x16xf32, #tpu.memory_space<vmem>>, vector<16x16xf32>,
    %cst_67 = arith.constant dense<0.000000e+00> : vector<8x16xf32>
    %84 = tpu.matmul %1, %2, %cst_67 {dimension_numbers = #tpu.dot_dimension_numbers<[1], [0], [0], [1], [0, 0, 1, 1], [], []>} : vector<8x16xf32>, vector<16x16xf32>, vector<8x16xf32> -> vector<8x16xf32>
    %cst_68 = arith.constant dense<0.000000e+00> : vector<16xf32>
    %85 = vector.multi_reduction <add>, %84, %cst_68 [0] : vector<8x16xf32> to vector<16xf32>
    %86 = vector.shape_cast %85 : vector<16xf32> to vector<1x16xf32>
    %cst_69 = arith.constant 8.000000e+00 : f32
    %87 = vector.broadcast %cst_69 : f32 to vector<1x16xf32>
    %88 = arith.divf %86, %87 : vector<1x16xf32>
    %89 = vector.broadcast %88 : vector<1x16xf32> to vector<8x16xf32>
    %90 = arith.subf %1, %89 : vector<8x16xf32>
    %91 = arith.mulf %90, %90 : vector<8x16xf32>
    %cst_70 = arith.constant dense<0.000000e+00> : vector<8x16xf32>
    %92 = tpu.matmul %91, %2, %cst_70 {dimension_numbers = #tpu.dot_dimension_numbers<[1], [0], [0], [1], [0, 0, 1, 1], [], []>} : vector<8x16xf32>, vector<16x16xf32>, vector<8x16xf32> -> vector<8x16xf32>
    %cst_71 = arith.constant dense<0.000000e+00> : vector<16xf32>
    %93 = vector.multi_reduction <add>, %92, %cst_71 [0] : vector<8x16xf32> to vector<16xf32>
    %94 = vector.shape_cast %93 : vector<16xf32> to vector<1x16xf32>
    %cst_72 = arith.constant 8.000000e+00 : f32
    %95 = vector.broadcast %cst_72 : f32 to vector<1x16xf32>
    %96 = arith.divf %94, %95 : vector<1x16xf32>
    %cst_73 = arith.constant 9.99999974E-6 : f32
    %97 = vector.broadcast %cst_73 : f32 to vector<1x16xf32>
    %98 = arith.addf %96, %97 : vector<1x16xf32>
    %99 = math.rsqrt %98 : vector<1x16xf32>
    %100 = vector.broadcast %99 : vector<1x16xf32> to vector<8x16xf32>
    %101 = arith.mulf %90, %100 : vector<8x16xf32>
    %102 = arith.mulf %101, %13 : vector<8x16xf32>
    %103 = arith.addf %102, %14 : vector<8x16xf32>
    %cst_74 = arith.constant dense<0.000000e+00> : vector<8x16xf32>
    %104 = tpu.matmul %17, %103, %cst_74 {dimension_numbers = #tpu.dot_dimension_numbers<[1], [0], [0], [1], [0, 0, 1, 1], [], []>} : vector<8x8xf32>, vector<8x16xf32>, vector<8x16xf32> -> vector<8x16xf32>
    %105 = vector.broadcast %18 : vector<8x1xf32> to vector<8x16xf32>
    %106 = arith.addf %104, %105 : vector<8x16xf32>
    %107 = arith.addf %106, %1 : vector<8x16xf32>
    %cst_75 = arith.constant dense<0.000000e+00> : vector<8x16xf32>
    %108 = tpu.matmul %107, %2, %cst_75 {dimension_numbers = #tpu.dot_dimension_numbers<[1], [0], [0], [1], [0, 0, 1, 1], [], []>} : vector<8x16xf32>, vector<16x16xf32>, vector<8x16xf32> -> vector<8x16xf32>
    %cst_76 = arith.constant dense<0.000000e+00> : vector<16xf32>
    %109 = vector.multi_reduction <add>, %108, %cst_76 [0] : vector<8x16xf32> to vector<16xf32>
    %110 = vector.shape_cast %109 : vector<16xf32> to vector<1x16xf32>
    %cst_77 = arith.constant 8.000000e+00 : f32
    %111 = vector.broadcast %cst_77 : f32 to vector<1x16xf32>
    %112 = arith.divf %110, %111 : vector<1x16xf32>
    %113 = vector.broadcast %112 : vector<1x16xf32> to vector<8x16xf32>
    %114 = arith.subf %107, %113 : vector<8x16xf32>
    %115 = arith.mulf %114, %114 : vector<8x16xf32>
    %cst_78 = arith.constant dense<0.000000e+00> : vector<8x16xf32>
    %116 = tpu.matmul %115, %2, %cst_78 {dimension_numbers = #tpu.dot_dimension_numbers<[1], [0], [0], [1], [0, 0, 1, 1], [], []>} : vector<8x16xf32>, vector<16x16xf32>, vector<8x16xf32> -> vector<8x16xf32>
    %cst_79 = arith.constant dense<0.000000e+00> : vector<16xf32>
    %117 = vector.multi_reduction <add>, %116, %cst_79 [0] : vector<8x16xf32> to vector<16xf32>
    %118 = vector.shape_cast %117 : vector<16xf32> to vector<1x16xf32>
    %cst_80 = arith.constant 8.000000e+00 : f32
    %119 = vector.broadcast %cst_80 : f32 to vector<1x16xf32>
    %120 = arith.divf %118, %119 : vector<1x16xf32>
    %cst_81 = arith.constant 9.99999974E-6 : f32
    %121 = vector.broadcast %cst_81 : f32 to vector<1x16xf32>
    %122 = arith.addf %120, %121 : vector<1x16xf32>
    %123 = math.rsqrt %122 : vector<1x16xf32>
    %124 = vector.broadcast %123 : vector<1x16xf32> to vector<8x16xf32>
    %125 = arith.mulf %114, %124 : vector<8x16xf32>
    %126 = arith.mulf %125, %15 : vector<8x16xf32>
    %127 = arith.addf %126, %16 : vector<8x16xf32>
    %cst_82 = arith.constant dense<0.000000e+00> : vector<8x16xf32>
    %128 = tpu.matmul %127, %19, %cst_82 {dimension_numbers = #tpu.dot_dimension_numbers<[1], [0], [0], [1], [0, 0, 1, 1], [], []>} : vector<8x16xf32>, vector<16x16xf32>, vector<8x16xf32> -> vector<8x16xf32>
    %129 = vector.broadcast %20 : vector<1x16xf32> to vector<8x16xf32>
    %130 = arith.addf %128, %129 : vector<8x16xf32>
    %cst_83 = arith.constant 5.000000e-01 : f32
    %131 = vector.broadcast %cst_83 : f32 to vector<8x16xf32>
    %132 = arith.mulf %131, %130 : vector<8x16xf32>
    %cst_84 = arith.constant 0.707106769 : f32
    %133 = vector.broadcast %cst_84 : f32 to vector<8x16xf32>
    %134 = arith.mulf %130, %133 : vector<8x16xf32>
    %135 = math.erf %134 : vector<8x16xf32>
    %cst_85 = arith.constant 1.000000e+00 : f32
    %136 = vector.broadcast %cst_85 : f32 to vector<8x16xf32>
    %137 = arith.addf %136, %135 : vector<8x16xf32>
    %138 = arith.mulf %132, %137 : vector<8x16xf32>
    %cst_86 = arith.constant dense<0.000000e+00> : vector<8x16xf32>
    %139 = tpu.matmul %138, %21, %cst_86 {dimension_numbers = #tpu.dot_dimension_numbers<[1], [0], [0], [1], [0, 0, 1, 1], [], []>} : vector<8x16xf32>, vector<16x16xf32>, vector<8x16xf32> -> vector<8x16xf32>
    %140 = vector.broadcast %22 : vector<1x16xf32> to vector<8x16xf32>
    %141 = arith.addf %139, %140 : vector<8x16xf32>
    %142 = arith.addf %127, %141 : vector<8x16xf32>
    %c32 = arith.constant 32 : index
    %c0_87 = arith.constant 0 : index
    %143 = vector.load %arg24[%c32, %c0_87] : memref<40x16xf32, #tpu.memory_space<vmem>>, vector<8x16xf32>
    tpu.vector_store %arg24[%c32, %c0_87], %142 {strides = array<i32>} : memref<40x16xf32, #tpu.memory_space<vmem>>, vector<8x16xf32>,
    return
  }
  func.func @transform_0(%arg0: i32) -> (i32, i32) {
    %c0_i32 = arith.constant 0 : i32
    %c0_i32_0 = arith.constant 0 : i32
    return %c0_i32, %arg0 : i32, i32
  }
  func.func @transform_1(%arg0: i32) -> (i32, i32) {
    %c0_i32 = arith.constant 0 : i32
    %c0_i32_0 = arith.constant 0 : i32
    return %c0_i32, %arg0 : i32, i32
  }
  func.func @transform_2(%arg0: i32) -> (i32, i32) {
    %c0_i32 = arith.constant 0 : i32
    %c0_i32_0 = arith.constant 0 : i32
    %c0_i32_1 = arith.constant 0 : i32
    return %c0_i32, %c0_i32_0 : i32, i32
  }
  func.func @transform_3(%arg0: i32) -> (i32, i32) {
    %c0_i32 = arith.constant 0 : i32
    %c0_i32_0 = arith.constant 0 : i32
    %c0_i32_1 = arith.constant 0 : i32
    return %c0_i32, %c0_i32_0 : i32, i32
  }
  func.func @transform_4(%arg0: i32) -> (i32, i32) {
    %c0_i32 = arith.constant 0 : i32
    %c0_i32_0 = arith.constant 0 : i32
    %c0_i32_1 = arith.constant 0 : i32
    return %c0_i32, %c0_i32_0 : i32, i32
  }
  func.func @transform_5(%arg0: i32) -> (i32, i32) {
    %c0_i32 = arith.constant 0 : i32
    %c0_i32_0 = arith.constant 0 : i32
    %c0_i32_1 = arith.constant 0 : i32
    return %c0_i32, %c0_i32_0 : i32, i32
  }
  func.func @transform_6(%arg0: i32) -> (i32, i32) {
    %c0_i32 = arith.constant 0 : i32
    %c0_i32_0 = arith.constant 0 : i32
    %c0_i32_1 = arith.constant 0 : i32
    return %c0_i32, %c0_i32_0 : i32, i32
  }
  func.func @transform_7(%arg0: i32) -> (i32, i32) {
    %c0_i32 = arith.constant 0 : i32
    %c0_i32_0 = arith.constant 0 : i32
    %c0_i32_1 = arith.constant 0 : i32
    return %c0_i32, %c0_i32_0 : i32, i32
  }
  func.func @transform_8(%arg0: i32) -> (i32, i32) {
    %c0_i32 = arith.constant 0 : i32
    %c0_i32_0 = arith.constant 0 : i32
    %c0_i32_1 = arith.constant 0 : i32
    return %c0_i32, %c0_i32_0 : i32, i32
  }
  func.func @transform_9(%arg0: i32) -> (i32, i32) {
    %c0_i32 = arith.constant 0 : i32
    %c0_i32_0 = arith.constant 0 : i32
    %c0_i32_1 = arith.constant 0 : i32
    return %c0_i32, %c0_i32_0 : i32, i32
  }
  func.func @transform_10(%arg0: i32) -> (i32, i32) {
    %c0_i32 = arith.constant 0 : i32
    %c0_i32_0 = arith.constant 0 : i32
    %c0_i32_1 = arith.constant 0 : i32
    return %c0_i32, %c0_i32_0 : i32, i32
  }
  func.func @transform_11(%arg0: i32) -> (i32, i32) {
    %c0_i32 = arith.constant 0 : i32
    %c0_i32_0 = arith.constant 0 : i32
    %c0_i32_1 = arith.constant 0 : i32
    return %c0_i32, %c0_i32_0 : i32, i32
  }
  func.func @transform_12(%arg0: i32) -> (i32, i32) {
    %c0_i32 = arith.constant 0 : i32
    %c0_i32_0 = arith.constant 0 : i32
    %c0_i32_1 = arith.constant 0 : i32
    return %c0_i32, %c0_i32_0 : i32, i32
  }
  func.func @transform_13(%arg0: i32) -> (i32, i32) {
    %c0_i32 = arith.constant 0 : i32
    %c0_i32_0 = arith.constant 0 : i32
    %c0_i32_1 = arith.constant 0 : i32
    return %c0_i32, %c0_i32_0 : i32, i32
  }
  func.func @transform_14(%arg0: i32) -> (i32, i32) {
    %c0_i32 = arith.constant 0 : i32
    %c0_i32_0 = arith.constant 0 : i32
    %c0_i32_1 = arith.constant 0 : i32
    return %c0_i32, %c0_i32_0 : i32, i32
  }
  func.func @transform_15(%arg0: i32) -> (i32, i32) {
    %c0_i32 = arith.constant 0 : i32
    %c0_i32_0 = arith.constant 0 : i32
    %c0_i32_1 = arith.constant 0 : i32
    return %c0_i32, %c0_i32_0 : i32, i32
  }
  func.func @transform_16(%arg0: i32) -> (i32, i32) {
    %c0_i32 = arith.constant 0 : i32
    %c0_i32_0 = arith.constant 0 : i32
    %c0_i32_1 = arith.constant 0 : i32
    return %c0_i32, %c0_i32_0 : i32, i32
  }
  func.func @transform_17(%arg0: i32) -> (i32, i32) {
    %c0_i32 = arith.constant 0 : i32
    %c0_i32_0 = arith.constant 0 : i32
    %c0_i32_1 = arith.constant 0 : i32
    return %c0_i32, %c0_i32_0 : i32, i32
  }
  func.func @transform_18(%arg0: i32) -> (i32, i32) {
    %c0_i32 = arith.constant 0 : i32
    %c0_i32_0 = arith.constant 0 : i32
    %c0_i32_1 = arith.constant 0 : i32
    return %c0_i32, %c0_i32_0 : i32, i32
  }
  func.func @transform_19(%arg0: i32) -> (i32, i32) {
    %c0_i32 = arith.constant 0 : i32
    %c0_i32_0 = arith.constant 0 : i32
    %c0_i32_1 = arith.constant 0 : i32
    return %c0_i32, %c0_i32_0 : i32, i32
  }
  func.func @transform_20(%arg0: i32) -> (i32, i32) {
    %c0_i32 = arith.constant 0 : i32
    %c0_i32_0 = arith.constant 0 : i32
    %c0_i32_1 = arith.constant 0 : i32
    return %c0_i32, %c0_i32_0 : i32, i32
  }
  func.func @transform_21(%arg0: i32) -> (i32, i32) {
    %c0_i32 = arith.constant 0 : i32
    %c0_i32_0 = arith.constant 0 : i32
    %c0_i32_1 = arith.constant 0 : i32
    return %c0_i32, %c0_i32_0 : i32, i32
  }
  func.func @transform_22(%arg0: i32) -> (i32, i32) {
    %c0_i32 = arith.constant 0 : i32
    %c0_i32_0 = arith.constant 0 : i32
    %c0_i32_1 = arith.constant 0 : i32
    return %c0_i32, %c0_i32_0 : i32, i32
  }
  func.func @transform_23(%arg0: i32) -> (i32, i32) {
    %c0_i32 = arith.constant 0 : i32
    %c0_i32_0 = arith.constant 0 : i32
    return %c0_i32, %arg0 : i32, i32
  }
}

</mosaic_0001>

<bundles_post_ra>
// kernel: mult_time_2d_mixer.1
= control target key start
LH: loop header
LB: loop body
LE: loop exit
PB: predicated region body
PF: predicated region fallthrough
CT: control target
= control target key end

     0   :  { %vm109_vm0 = vcmask 130048   ;;  %v1605_v22 = vmov 0   ;;  %vm1607_vm1 = vmmov 0   ;;  %vm957_vm2 = vcmask 64512   ;;  %s1946_s2 = inlined_call_operand.vmem [shape: f32[16,16], index: 2, kind: input, shape index: {}]   ;;  %s1947_s0 = inlined_call_operand.vmem [shape: f32[16,16], index: 0, kind: input, shape index: {}]   ;;  %s1948_s23 = inlined_call_operand.vmem [shape: f32[40,16], index: 23, kind: output, shape index: {}]   ;;  %s1949_s7 = inlined_call_operand.vmem [shape: f32[16,16], index: 7, kind: input, shape index: {}]   ;;  %s1950_s8 = inlined_call_operand.vmem [shape: f32[16,1], index: 8, kind: input, shape index: {}]   ;;  %s1951_s3 = inlined_call_operand.vmem [shape: f32[16,16], index: 3, kind: input, shape index: {}]   ;;  %s1952_s4 = inlined_call_operand.vmem [shape: f32[16,16], index: 4, kind: input, shape index: {}]   ;;  %s1953_s9 = inlined_call_operand.vmem [shape: f32[16,16], index: 9, kind: input, shape index: {}]   ;;  %s1954_s5 = inlined_call_operand.vmem [shape: f32[16,16], index: 5, kind: input, shape index: {}]   ;;  %s1955_s6 = inlined_call_operand.vmem [shape: f32[16,16], index: 6, kind: input, shape index: {}]   ;;  %s1956_s1 = inlined_call_operand.vmem [shape: f32[8,16], index: 1, kind: input, shape index: {}]   ;;  %s1957_s11 = inlined_call_operand.vmem [shape: f32[16,16], index: 11, kind: input, shape index: {}]   ;;  %s1958_s10 = inlined_call_operand.vmem [shape: f32[1,16], index: 10, kind: input, shape index: {}]   ;;  %s1959_s18 = inlined_call_operand.vmem [shape: f32[8,1], index: 18, kind: input, shape index: {}]   ;;  %s1960_s12 = inlined_call_operand.vmem [shape: f32[1,16], index: 12, kind: input, shape index: {}]   ;;  %s1961_s13 = inlined_call_operand.vmem [shape: f32[8,16], index: 13, kind: input, shape index: {}]   ;;  %s1962_s14 = inlined_call_operand.vmem [shape: f32[8,16], index: 14, kind: input, shape index: {}]   ;;  %s1963_s17 = inlined_call_operand.vmem [shape: f32[8,8], index: 17, kind: input, shape index: {}]   ;;  %s1964_s19 = inlined_call_operand.vmem [shape: f32[16,16], index: 19, kind: input, shape index: {}]   ;;  %s1965_s15 = inlined_call_operand.vmem [shape: f32[8,16], index: 15, kind: input, shape index: {}]   ;;  %s1966_s16 = inlined_call_operand.vmem [shape: f32[8,16], index: 16, kind: input, shape index: {}]   ;;  %s1967_s21 = inlined_call_operand.vmem [shape: f32[16,16], index: 21, kind: input, shape index: {}]   ;;  %s1968_s20 = inlined_call_operand.vmem [shape: f32[1,16], index: 20, kind: input, shape index: {}]   ;;  %s1969_s22 = inlined_call_operand.vmem [shape: f32[1,16], index: 22, kind: input, shape index: {}]  }
   0x1   :  { %1978 = sst [smem:[#allocation2_spill]] %s1946_s2  ;;  %1589 = vset.pattern.permute.xlu0 %v1605_v22  ;;  %1590 = vset.pattern.permute.xlu1 %v1605_v22 }
   0x2   :  { %1979 = sst [smem:[#allocation3_spill]] %s1947_s0  ;;  %s1986_s24 = sld [smem:[#allocation2_spill]] }
   0x3   :  { %1980 = sst [smem:[#allocation4_spill]] %s1948_s23  ;;  %s1987_s26 = sld [smem:[#allocation3_spill]] }
   0x4   :  { %1981 = sst [smem:[#allocation5_spill]] %s1949_s7 }
   0x5   :  { %1982 = sst [smem:[#allocation6_spill]] %s1950_s8 }
   0x6   :  { %1983 = sst [smem:[#allocation7_spill]] %s1951_s3  ;;  %s1990_s0 = sld [smem:[#allocation6_spill]] }
   0x7   :  { %1984 = sst [smem:[#allocation8_spill]] %s1952_s4  ;;  %s1991_s28 = sld [smem:[#allocation7_spill]] }
   0x8   :  { %1985 = sst [smem:[#allocation9_spill]] %s1953_s9  ;;  %v77_v0 = vld [vmem:[%s1986_s24] sm:$0xff]  ;;  %v78_v1 = vld [vmem:[%s1986_s24 + $0x8] sm:$0xff]  ;;  %s1988_s9 = sld [smem:[#allocation4_spill]] }
   0x9   :  { %v1738_v2 = vld [vmem:[%s1987_s26] sm:$0xff]  ;;  %v1740_v3 = vpack.c.bf16 %v78_v1, %v77_v0  ;;  %v1752_v4 = vld [vmem:[%s1987_s26 + $0x8] sm:$0xff]  ;;  %s1989_s24 = sld [smem:[#allocation5_spill]]  ;;  %s1992_s30 = sld [smem:[#allocation8_spill]] }
   0xa   :  { %1447 = vmatprep.mubr.msk.f32.mxu0 %vm109_vm0, %v1738_v2  ;;  %s1993_s23 = sld [smem:[#allocation9_spill]] }
   0xb   :  { %1540 = vmatprep.subr.bf16.mxu0 %v1740_v3  ;;  %1544 = vmatprep.subr.bf16.mxu1 %v1740_v3 }
   0xc   :  { %1542 = vmatpush3.bf16.msra.mxu0 %v1740_v3  ;;  %1546 = vmatpush3.bf16.msra.mxu1 %v1740_v3  ;;  %v89_v23 = vld [vmem:[%s1990_s0] sm:$0xff]  ;;  %v90_v24 = vld [vmem:[%s1990_s0 + $0x8] sm:$0xff] }
   0xd   :  { %1552 = vmatprep.subr.bf16.mxu1 %v1740_v3  ;;  %309 = vperm.xlu0 %1589, %v89_v23   ;;  %v79_v39 = vld [vmem:[%s1991_s28] sm:$0xff]  ;;  %v80_v40 = vld [vmem:[%s1991_s28 + $0x8] sm:$0xff] }
   0xe   :  { %110 = vst.msk [vmem:[%s1988_s9] sm:$0xff] %vm109_vm0, %v1738_v2  ;;  %111 = vst.msk [vmem:[%s1988_s9 + $0x8] sm:$0xff] %vm109_vm0, %v1752_v4 }
   0xf   :  { %1448 = vmatmul.mubr.msk.f32.vlgmr.msra.gmra.mrb[0].mxu0 %vm109_vm0, %v1752_v4  ;;  %v87_v21 = vld [vmem:[%s1989_s24] sm:$0xff]  ;;  %v82_v44 = vld [vmem:[%s1992_s30 + $0x8] sm:$0xff] }
  0x10   :  { %1461 = vmatprep.mubr.msk.f32.mxu0 %vm109_vm0, %v87_v21  ;;  %v81_v43 = vld [vmem:[%s1992_s30] sm:$0xff]  ;;  %v88_v50 = vld [vmem:[%s1989_s24 + $0x8] sm:$0xff] }
  0x11   :  { %314 = vperm.xlu0 %1589, %v90_v24  }
  0x8c   :  { %v310_v51 = vpop.permute.xlu0 %309 }
  0x90   :  { %v315_v52 = vpop.permute.xlu0 %314 }
  0xe2   :  { %v1449_v5 = vpop.f32.mrb[0].mxu0 }
  0xe3   :  { %v194_v6 = vsel %vm109_vm0, %v1449_v5, 0.0  ;;  %v184_v7 = vpop.f32.mrb[1].mxu0 }
  0xe4   :  { %v193_v8 = vsel %vm109_vm0, %v184_v7, 0.0 }
  0xe5   :  { %v195_v9 = vadd.f32 %v194_v6, %v193_v8 }
  0xe7   :  { %v196_v10 = vrot.slane %v195_v9, 4 }
  0xe9   :  { %v197_v11 = vadd.f32 %v196_v10, %v195_v9 }
  0xeb   :  { %v198_v12 = vrot.slane %v197_v11, 2 }
  0xed   :  { %v199_v13 = vadd.f32 %v198_v12, %v197_v11  ;;  %v91_v12 = vld [vmem:[%s1993_s23] sm:$0xff] }
  0xef   :  { %v200_v14 = vrot.slane %v199_v13, 1 }
  0xf1   :  { %v201_v15 = vadd.f32 %v200_v14, %v199_v13  ;;  %v92_v13 = vld [vmem:[%s1993_s23 + $0x8] sm:$0xff] }
  0xf2   :  { %v1559_v14 = vpack.c.bf16 %v92_v13, %v91_v12 }
  0xf3   :  { %v203_v16 = vmul.f32 0.0625, %v201_v15  ;;  %v1606_v15 = vmov 0.0|0.0  }
  0xf5   :  { %v204_v17 = vsub.f32 %v1738_v2, %v203_v16  ;;  %v205_v18 = vsub.f32 %v1752_v4, %v203_v16 }
  0xf7   :  { %v206_v19 = vmul.f32 %v204_v17, %v204_v17  ;;  %v207_v20 = vmul.f32 %v205_v18, %v205_v18 }
  0xf9   :  { %1454 = vmatprep.mubr.msk.f32.mxu1 %vm109_vm0, %v206_v19 }
  0xfa   :  { %1455 = vmatmul.mubr.msk.f32.vlgmr.msra.gmra.mrb[0].mxu1 %vm109_vm0, %v207_v20 }
  0xfb   :  { %1554 = vmatpush3.bf16.msra.mxu1 %v1740_v3 }
  0xfc   :  { %1560 = vmatprep.subr.bf16.mxu1 %v1559_v14 }
 0x1cd   :  { %v1456_v25 = vpop.f32.mrb[0].mxu1 }
 0x1ce   :  { %v290_v26 = vsel %vm109_vm0, %v1456_v25, 0.0  ;;  %v280_v27 = vpop.f32.mrb[1].mxu1 }
 0x1cf   :  { %v289_v28 = vsel %vm109_vm0, %v280_v27, 0.0 }
 0x1d0   :  { %v291_v29 = vadd.f32 %v290_v26, %v289_v28 }
 0x1d2   :  { %v292_v30 = vrot.slane %v291_v29, 4 }
 0x1d4   :  { %v293_v31 = vadd.f32 %v292_v30, %v291_v29  ;;  %v83_v30 = vld [vmem:[%s1954_s5] sm:$0xff] }
 0x1d6   :  { %v294_v32 = vrot.slane %v293_v31, 2 }
 0x1d8   :  { %v295_v33 = vadd.f32 %v294_v32, %v293_v31  ;;  %v84_v31 = vld [vmem:[%s1954_s5 + $0x8] sm:$0xff] }
 0x1da   :  { %v296_v34 = vrot.slane %v295_v33, 1 }
 0x1dc   :  { %v297_v35 = vadd.f32 %v296_v34, %v295_v33  ;;  %v85_v34 = vld [vmem:[%s1955_s6] sm:$0xff] }
 0x1de   :  { %v298_v36 = vmul.f32 0.0625, %v297_v35  ;;  %v86_v35 = vld [vmem:[%s1955_s6 + $0x8] sm:$0xff] }
 0x1e0   :  { %v299_v37 = vadd.f32 1e-05, %v298_v36 }
 0x1e2   :  { %1591 = vrsqrt.f32 %v299_v37 }
 0x1ec   :  { %v1592_v38 = vpop.eup %1591 }
 0x1ed   :  { %v301_v41 = vmul.f32 %v1592_v38, %v204_v17  ;;  %v302_v42 = vmul.f32 %v1592_v38, %v205_v18 }
 0x1ef   :  { %v303_v45 = vmul.f32 %v301_v41, %v79_v39  ;;  %v304_v46 = vmul.f32 %v302_v42, %v80_v40  ;;  %v1608_v40 = vmov 0.0   ;;  %v1846_v41 = vld [vmem:[%s1956_s1] sm:$0xff] }
 0x1f0   :  { %v94_v42 = vld [vmem:[%s1957_s11] sm:$0xff] }
 0x1f1   :  { %v305_v47 = vadd.f32 %v303_v45, %v81_v43  ;;  %v306_v48 = vadd.f32 %v304_v46, %v82_v44  ;;  %v95_v43 = vld [vmem:[%s1957_s11 + $0x8] sm:$0xff]  ;;  %v1380_v45 = vld [vmem:[%s1958_s10] ss:$0 sm:$0xff] }
 0x1f2   :  { %v1563_v44 = vpack.c.bf16 %v95_v43, %v94_v42 }
 0x1f3   :  { %v1547_v49 = vpack.c.bf16 %v306_v48, %v305_v47 }
 0x1f5   :  { %1548 = vmatprep.subr.bf16.mxu0 %v1547_v49 }
 0x1f6   :  { %1550 = vmatpush3.bf16.msra.mxu0 %v1547_v49 }
 0x1f7   :  { %1556 = vmatprep.subr.bf16.mxu0 %v1740_v3 }
 0x1f9   :  { %1462 = vmatmul.mubr.msk.f32.vlgmr.msra.gmra.mrb[2].mxu0 %vm109_vm0, %v88_v50 }
 0x1fa   :  { %1558 = vmatpush3.bf16.msra.mxu0 %v1740_v3 }
 0x1fb   :  { %1564 = vmatprep.subr.bf16.mxu0 %v1563_v44 }
 0x2cc   :  { %v1463_v53 = vpop.f32.mrb[2].mxu0 }
 0x2cd   :  { %v395_v54 = vadd.f32 %v1463_v53, %v315_v52  ;;  %v389_v55 = vpop.f32.mrb[3].mxu0 }
 0x2ce   :  { %v390_v56 = vadd.f32 %v389_v55, %v310_v51 }
 0x2cf   :  { %v399_v58 = vadd.f32 %v395_v54, %v1752_v4 }
 0x2d0   :  { %v398_v57 = vadd.f32 %v390_v56, %v1738_v2 }
 0x2d2   :  { %1468 = vmatprep.mubr.msk.f32.mxu1 %vm109_vm0, %v398_v57 }
 0x2d3   :  { %1469 = vmatmul.mubr.msk.f32.vlgmr.msra.gmra.mrb[2].mxu1 %vm109_vm0, %v399_v58 }
 0x2d4   :  { %1562 = vmatpush3.bf16.msra.mxu1 %v1559_v14 }
 0x2d5   :  { %1567 = vmatprep.subr.bf16.mxu1 %v1606_v15 }
 0x3a6   :  { %v1470_v59 = vpop.f32.mrb[2].mxu1 }
 0x3a7   :  { %v482_v60 = vsel %vm109_vm0, %v1470_v59, 0.0  ;;  %v472_v61 = vpop.f32.mrb[3].mxu1 }
 0x3a8   :  { %v481_v62 = vsel %vm109_vm0, %v472_v61, 0.0 }
 0x3a9   :  { %v483_v63 = vadd.f32 %v482_v60, %v481_v62 }
 0x3ab   :  { %v484_v0 = vrot.slane %v483_v63, 4 }
 0x3ad   :  { %v485_v1 = vadd.f32 %v484_v0, %v483_v63 }
 0x3af   :  { %v486_v5 = vrot.slane %v485_v1, 2 }
 0x3b1   :  { %v487_v6 = vadd.f32 %v486_v5, %v485_v1 }
 0x3b3   :  { %v488_v7 = vrot.slane %v487_v6, 1 }
 0x3b5   :  { %v489_v8 = vadd.f32 %v488_v7, %v487_v6 }
 0x3b7   :  { %v490_v2 = vmul.f32 0.0625, %v489_v8 }
 0x3b9   :  { %v492_v9 = vsub.f32 %v399_v58, %v490_v2  ;;  %v491_v4 = vsub.f32 %v398_v57, %v490_v2 }
 0x3bb   :  { %v493_v10 = vmul.f32 %v491_v4, %v491_v4  ;;  %v494_v11 = vmul.f32 %v492_v9, %v492_v9 }
 0x3bd   :  { %1475 = vmatprep.mubr.msk.f32.mxu0 %vm109_vm0, %v493_v10  ;;  %v1383_v10 = vld [vmem:[%s1960_s12] ss:$0 sm:$0xff] }
 0x3be   :  { %1476 = vmatmul.mubr.msk.f32.vlgmr.msra.gmra.mrb[4].mxu0 %vm109_vm0, %v494_v11 }
 0x3bf   :  { %1566 = vmatpush3.bf16.msra.mxu0 %v1563_v44 }
 0x3c0   :  { %1570 = vmatprep.subr.bf16.mxu0 %v1606_v15 }
 0x491   :  { %v1477_v16 = vpop.f32.mrb[4].mxu0 }
 0x492   :  { %v577_v17 = vsel %vm109_vm0, %v1477_v16, 0.0  ;;  %v567_v18 = vpop.f32.mrb[5].mxu0 }
 0x493   :  { %v576_v19 = vsel %vm109_vm0, %v567_v18, 0.0 }
 0x494   :  { %v578_v20 = vadd.f32 %v577_v17, %v576_v19 }
 0x496   :  { %v579_v21 = vrot.slane %v578_v20, 4 }
 0x498   :  { %v580_v22 = vadd.f32 %v579_v21, %v578_v20 }
 0x49a   :  { %v581_v23 = vrot.slane %v580_v22, 2 }
 0x49c   :  { %v582_v24 = vadd.f32 %v581_v23, %v580_v22 }
 0x49e   :  { %v583_v25 = vrot.slane %v582_v24, 1 }
 0x4a0   :  { %v584_v26 = vadd.f32 %v583_v25, %v582_v24 }
 0x4a2   :  { %v585_v27 = vmul.f32 0.0625, %v584_v26 }
 0x4a4   :  { %v586_v28 = vadd.f32 1e-05, %v585_v27 }
 0x4a6   :  { %1593 = vrsqrt.f32 %v586_v28 }
 0x4b0   :  { %v1594_v29 = vpop.eup %1593 }
 0x4b1   :  { %v588_v32 = vmul.f32 %v1594_v29, %v491_v4  ;;  %v589_v33 = vmul.f32 %v1594_v29, %v492_v9  ;;  %v102_v4 = vld [vmem:[%s1959_s18] sm:$0xff] }
 0x4b2   :  { %954 = vperm.xlu1 %1590, %v102_v4   ;;  %v107_v4 = vld [vmem:[%s1967_s21 + $0x8] sm:$0xff] }
 0x4b3   :  { %v590_v36 = vmul.f32 %v588_v32, %v83_v30  ;;  %v591_v37 = vmul.f32 %v589_v33, %v84_v31  ;;  %v97_v30 = vld [vmem:[%s1961_s13] sm:$0xff] }
 0x4b4   :  { %v98_v32 = vld [vmem:[%s1962_s14] sm:$0xff] }
 0x4b5   :  { %v1832_v38 = vadd.f32 %v590_v36, %v85_v34  ;;  %v1834_v39 = vadd.f32 %v591_v37, %v86_v35  ;;  %v101_v35 = vld [vmem:[%s1963_s17] sm:$0xff] }
 0x4b7   :  { %1482 = vmatprep.mubr.msk.f32.mxu1 %vm109_vm0, %v1832_v38 }
 0x4b8   :  { %1483 = vmatmul.mubr.msk.f32.vlgmr.msra.gmra.mrb[4].mxu1 %vm109_vm0, %v1834_v39 }
 0x4b9   :  { %1569 = vmatpush3.bf16.msra.mxu1 %v1740_v3  ;;  %1496 = vmatprep.mubr.msk.f32.mxu1 %vm1607_vm1, %v1608_v40 }
 0x4ba   :  { %1506 = vmatprep.subr.mxu1 %v1608_v40 }
 0x4bc   :  { %1497 = vmatmul.mubr.msk.f32.vlgmr.msra.gmra.mrb[6].mxu1 %vm109_vm0, %v1846_v41 }
 0x4bd   :  { %1508 = vmatprep.mubr.msk.f32.mxu1 %vm1607_vm1, %v1608_v40 }
 0x531   :  { %v955_v36 = vpop.permute.xlu1 %954 }
 0x58b   :  { %v1484_v46 = vpop.f32.mrb[4].mxu1 }
 0x58c   :  { %v678_v47 = vadd.f32 %v1484_v46, %v1380_v45  ;;  %v672_v48 = vpop.f32.mrb[5].mxu1 }
 0x58d   :  { %v673_v49 = vadd.f32 %v1380_v45, %v672_v48 }
 0x58e   :  { %v684_v50 = vmul.f32 0.70710677, %v678_v47  ;;  %v682_v5 = vmul.f32 0.5, %v678_v47 }
 0x58f   :  { %v683_v51 = vmul.f32 0.70710677, %v673_v49  ;;  %v851_v52 = vpop.f32.mrb[6].mxu1  ;;  %v681_v0 = vmul.f32 0.5, %v673_v49 }
 0x590   :  { %1595 = verf.f32 %v684_v50  ;;  %v855_v53 = vsel %vm109_vm0, %v851_v52, 0.0  ;;  %v1498_v54 = vpop.f32.mrb[7].mxu1 }
 0x591   :  { %1597 = verf.f32 %v683_v51  ;;  %v856_v55 = vrot.slane %v855_v53, 4 }
 0x593   :  { %v857_v56 = vadd.f32 %v856_v55, %v855_v53  ;;  %v104_v53 = vld [vmem:[%s1964_s19 + $0x8] sm:$0xff] }
 0x595   :  { %v858_v57 = vrot.slane %v857_v56, 2 }
 0x597   :  { %v859_v58 = vadd.f32 %v858_v57, %v857_v56 }
 0x599   :  { %v860_v59 = vrot.slane %v859_v58, 1 }
 0x59a   :  { %v1596_v60 = vpop.eup %1595 }
 0x59b   :  { %v1598_v61 = vpop.eup %1597  ;;  %v688_v62 = vadd.f32 1.0, %v1596_v60  ;;  %v861_v63 = vadd.f32 %v860_v59, %v859_v58 }
 0x59c   :  { %v687_v1 = vadd.f32 1.0, %v1598_v61 }
 0x59d   :  { %v863_v6 = vmul.f32 0.125, %v861_v63  ;;  %v690_v8 = vmul.f32 %v688_v62, %v682_v5  ;;  %v99_v5 = vld [vmem:[%s1965_s15] sm:$0xff] }
 0x59e   :  { %v689_v7 = vmul.f32 %v687_v1, %v681_v0 }
 0x59f   :  { %v864_v2 = vsub.f32 %v1846_v41, %v863_v6 }
 0x5a0   :  { %1489 = vmatprep.mubr.msk.f32.mxu0 %vm109_vm0, %v689_v7  ;;  %v100_v7 = vld [vmem:[%s1966_s16] sm:$0xff] }
 0x5a1   :  { %1490 = vmatmul.mubr.msk.f32.vlgmr.msra.gmra.mrb[6].mxu0 %vm109_vm0, %v690_v8  ;;  %v865_v9 = vmul.f32 %v864_v2, %v864_v2 }
 0x5a2   :  { %1572 = vmatpush3.bf16.msra.mxu0 %v1740_v3  ;;  %1503 = vmatprep.mubr.msk.f32.mxu0 %vm1607_vm1, %v1608_v40 }
 0x5a3   :  { %1573 = vmatprep.subr.bf16.mxu0 %v1606_v15 }
 0x5a5   :  { %1504 = vmatmul.mubr.msk.f32.vlgmr.msra.gmra.mrb[8].mxu0 %vm109_vm0, %v865_v9  ;;  %v106_v9 = vld [vmem:[%s1967_s21] sm:$0xff] }
 0x5a6   :  { %1575 = vmatpush3.bf16.msra.mxu0 %v1740_v3  ;;  %1515 = vmatprep.mubr.msk.f32.mxu0 %vm1607_vm1, %v1608_v40 }
 0x5a7   :  { %1579 = vmatprep.subr.bf16.mxu0 %v1606_v15 }
 0x674   :  { %v1491_v11 = vpop.f32.mrb[6].mxu0 }
 0x675   :  { %v775_v12 = vadd.f32 %v1491_v11, %v1383_v10  ;;  %v769_v13 = vpop.f32.mrb[7].mxu0  ;;  %v1391_v11 = vld [vmem:[%s1968_s20] ss:$0 sm:$0xff] }
 0x676   :  { %v770_v14 = vadd.f32 %v1383_v10, %v769_v13  ;;  %v1583_v10 = vpack.c.bf16 %v107_v4, %v106_v9 }
 0x677   :  { %v779_v16 = vadd.f32 %v775_v12, %v1834_v39 }
 0x678   :  { %v778_v17 = vadd.f32 %v770_v14, %v1832_v38  ;;  %v935_v18 = vpop.f32.mrb[8].mxu0 }
 0x679   :  { %781 = vst.msk [vmem:[%s1988_s9 + $0x18] sm:$0xff] %vm109_vm0, %v779_v16  ;;  %v939_v19 = vsel %vm109_vm0, %v935_v18, 0.0  ;;  %v1505_v20 = vpop.f32.mrb[9].mxu0 }
 0x67a   :  { %780 = vst.msk [vmem:[%s1988_s9 + $0x10] sm:$0xff] %vm109_vm0, %v778_v17  ;;  %v940_v21 = vrot.slane %v939_v19, 4 }
 0x67c   :  { %v941_v22 = vadd.f32 %v940_v21, %v939_v19  ;;  %v1393_v21 = vld [vmem:[%s1969_s22] ss:$0 sm:$0xff] }
 0x67e   :  { %v942_v23 = vrot.slane %v941_v22, 2 }
 0x680   :  { %v943_v24 = vadd.f32 %v942_v23, %v941_v22 }
 0x682   :  { %v944_v25 = vrot.slane %v943_v24, 1 }
 0x684   :  { %v945_v26 = vadd.f32 %v944_v25, %v943_v24 }
 0x686   :  { %v946_v27 = vmul.f32 0.125, %v945_v26 }
 0x688   :  { %v947_v28 = vadd.f32 1e-05, %v946_v27 }
 0x68a   :  { %1599 = vrsqrt.f32 %v947_v28 }
 0x694   :  { %v1600_v29 = vpop.eup %1599 }
 0x695   :  { %v949_v31 = vmul.f32 %v1600_v29, %v864_v2 }
 0x697   :  { %v950_v33 = vmul.f32 %v949_v31, %v97_v30 }
 0x699   :  { %v951_v34 = vadd.f32 %v950_v33, %v98_v32 }
 0x69b   :  { %1507 = vmatpush3.msra.mxu1 %v951_v34 }
 0x69c   :  { %1509 = vmatmul.mubr.msk.f32.vlgmr.msra.gmra.mrb[8].mxu1 %vm957_vm2, %v101_v35  ;;  %1576 = vmatprep.subr.bf16.mxu1 %v1606_v15 }
 0x69d   :  { %1578 = vmatpush3.bf16.msra.mxu1 %v1740_v3  ;;  %1522 = vmatprep.mubr.msk.f32.mxu1 %vm1607_vm1, %v1608_v40 }
 0x69e   :  { %1582 = vmatprep.subr.bf16.mxu1 %v1606_v15 }
 0x76f   :  { %v1027_v37 = vpop.f32.mrb[8].mxu1 }
 0x770   :  { %v1028_v38 = vadd.f32 %v1027_v37, %v955_v36  ;;  %v1510_v39 = vpop.f32.mrb[9].mxu1 }
 0x772   :  { %v1031_v42 = vadd.f32 %v1028_v38, %v1846_v41  ;;  %v103_v41 = vld [vmem:[%s1964_s19] sm:$0xff] }
 0x773   :  { %v1580_v54 = vpack.c.bf16 %v104_v53, %v103_v41 }
 0x774   :  { %1516 = vmatmul.mubr.msk.f32.vlgmr.msra.gmra.mrb[10].mxu0 %vm109_vm0, %v1031_v42 }
 0x775   :  { %1529 = vmatprep.mubr.msk.f32.mxu0 %vm1607_vm1, %v1608_v40  ;;  %1581 = vmatpush3.bf16.msra.mxu0 %v1580_v54 }
 0x847   :  { %v1101_v43 = vpop.f32.mrb[10].mxu0 }
 0x848   :  { %v1105_v44 = vsel %vm109_vm0, %v1101_v43, 0.0  ;;  %v1517_v3 = vpop.f32.mrb[11].mxu0 }
 0x849   :  { %v1106_v45 = vrot.slane %v1105_v44, 4 }
 0x84b   :  { %v1107_v46 = vadd.f32 %v1106_v45, %v1105_v44 }
 0x84d   :  { %v1108_v47 = vrot.slane %v1107_v46, 2 }
 0x84f   :  { %v1109_v48 = vadd.f32 %v1108_v47, %v1107_v46 }
 0x851   :  { %v1110_v15 = vrot.slane %v1109_v48, 1 }
 0x853   :  { %v1111_v49 = vadd.f32 %v1110_v15, %v1109_v48 }
 0x855   :  { %v1112_v50 = vmul.f32 0.125, %v1111_v49 }
 0x857   :  { %v1113_v51 = vsub.f32 %v1031_v42, %v1112_v50 }
 0x859   :  { %v1114_v52 = vmul.f32 %v1113_v51, %v1113_v51 }
 0x85b   :  { %1523 = vmatmul.mubr.msk.f32.vlgmr.msra.gmra.mrb[10].mxu1 %vm109_vm0, %v1114_v52 }
 0x85c   :  { %1536 = vmatprep.mubr.msk.f32.mxu1 %vm1607_vm1, %v1608_v40  ;;  %1584 = vmatpush3.bf16.msra.mxu1 %v1583_v10 }
 0x92e   :  { %v1184_v55 = vpop.f32.mrb[10].mxu1 }
 0x92f   :  { %v1188_v56 = vsel %vm109_vm0, %v1184_v55, 0.0  ;;  %v1524_v57 = vpop.f32.mrb[11].mxu1 }
 0x930   :  { %v1189_v58 = vrot.slane %v1188_v56, 4 }
 0x932   :  { %v1190_v59 = vadd.f32 %v1189_v58, %v1188_v56 }
 0x934   :  { %v1191_v60 = vrot.slane %v1190_v59, 2 }
 0x936   :  { %v1192_v61 = vadd.f32 %v1191_v60, %v1190_v59 }
 0x938   :  { %v1193_v62 = vrot.slane %v1192_v61, 1 }
 0x93a   :  { %v1194_v40 = vadd.f32 %v1193_v62, %v1192_v61 }
 0x93c   :  { %v1195_v63 = vmul.f32 0.125, %v1194_v40 }
 0x93e   :  { %v1196_v0 = vadd.f32 1e-05, %v1195_v63 }
 0x940   :  { %1601 = vrsqrt.f32 %v1196_v0 }
 0x94a   :  { %v1602_v1 = vpop.eup %1601 }
 0x94b   :  { %v1198_v6 = vmul.f32 %v1602_v1, %v1113_v51 }
 0x94d   :  { %v1199_v8 = vmul.f32 %v1198_v6, %v99_v5 }
 0x94f   :  { %v1200_v2 = vadd.f32 %v1199_v8, %v100_v7 }
 0x951   :  { %1530 = vmatmul.mubr.msk.f32.vlgmr.msra.gmra.mrb[12].mxu0 %vm109_vm0, %v1200_v2 }
 0xa24   :  { %v1276_v12 = vpop.f32.mrb[12].mxu0 }
 0xa25   :  { %v1277_v13 = vadd.f32 %v1391_v11, %v1276_v12  ;;  %v1531_v14 = vpop.f32.mrb[13].mxu0 }
 0xa27   :  { %v1281_v16 = vmul.f32 0.70710677, %v1277_v13  ;;  %v1280_v18 = vmul.f32 0.5, %v1277_v13 }
 0xa29   :  { %1603 = verf.f32 %v1281_v16 }
 0xa33   :  { %v1604_v17 = vpop.eup %1603 }
 0xa34   :  { %v1283_v19 = vadd.f32 1.0, %v1604_v17 }
 0xa36   :  { %v1284_v20 = vmul.f32 %v1283_v19, %v1280_v18 }
 0xa38   :  { %1537 = vmatmul.mubr.msk.f32.vlgmr.msra.gmra.mrb[12].mxu1 %vm109_vm0, %v1284_v20 }
 0xb0b   :  { %v1360_v22 = vpop.f32.mrb[12].mxu1 }
 0xb0c   :  { %v1361_v23 = vadd.f32 %v1393_v21, %v1360_v22  ;;  %v1538_v24 = vpop.f32.mrb[13].mxu1 }
 0xb0e   :  { %v1364_v25 = vadd.f32 %v1361_v23, %v1200_v2 }
 0xb10   :  { %1365 = vst.msk [vmem:[%s1988_s9 + $0x20] sm:$0xff] %vm109_vm0, %v1364_v25 }

</bundles_post_ra>
